<compile_context>
chip_gen: v7x
topology: tpu7x:2x2x1
jax: 0.10.0
libtpu: 0.0.40
codegen_flags: <defaults>
</compile_context>

<pallas_src>
import jax
import jax.numpy as jnp
from jax.experimental import pallas as pl
from jax.experimental.pallas import tpu as pltpu

_LANE = 128


def _swish_kernel(x_ref, o_ref):
    x = x_ref[...].astype(jnp.float32)
    # sigmoid(x) = 0.5 * (tanh(x/2) + 1)  -> tanh runs on the EUP slot.
    sig = 0.5 * (jnp.tanh(0.5 * x) + 1.0)
    o_ref[...] = (x * sig).astype(o_ref.dtype)


def _target_block_bytes() -> int:
    """Per-generation block size for this mem-bound elementwise kernel."""
    try:
        kind = jax.devices()[0].device_kind.lower()
    except Exception:
        kind = ""
    if "v7" in kind:
        # ~3.2 TB/s per TC: bigger blocks needed to amortize per-step overhead.
        return 8 * 1024 * 1024
    if "v6" in kind:
        return 4 * 1024 * 1024
    # v5e and unknown chips.
    return 4 * 1024 * 1024


def _swish_2d(x2d: jax.Array, tr: int, vmem_limit: int) -> jax.Array:
    rows = x2d.shape[0]
    grid = (pl.cdiv(rows, tr),)
    return pl.pallas_call(
        _swish_kernel,
        out_shape=jax.ShapeDtypeStruct(x2d.shape, x2d.dtype),
        grid_spec=pltpu.PrefetchScalarGridSpec(
            num_scalar_prefetch=0,
            grid=grid,
            in_specs=[pl.BlockSpec((tr, _LANE), lambda i: (i, 0))],
            out_specs=pl.BlockSpec((tr, _LANE), lambda i: (i, 0)),
        ),
        compiler_params=pltpu.CompilerParams(
            dimension_semantics=("parallel",),
            vmem_limit_bytes=vmem_limit,
        ),
    )(x2d)


def swish(x: jax.Array) -> jax.Array:
    """Elementwise x * sigmoid(x), matching the torch Swish forward."""
    orig_shape = x.shape
    dtype = x.dtype
    n = x.size
    if n == 0:
        return x

    itemsize = jnp.dtype(dtype).itemsize
    # Sublane granularity: 8 rows for 4-byte, 16 for 2-byte, 32 for 1-byte dtypes.
    sublane = max(8, 32 // max(itemsize, 1))

    x_flat = x.reshape(-1)
    n_main = (n // _LANE) * _LANE  # lane-aligned prefix handled by the kernel
    tail = n - n_main

    outs = []
    if n_main:
        rows = n_main // _LANE
        x2d = x_flat[:n_main].reshape(rows, _LANE)

        # Row tile targeting the per-generation block size.
        block_bytes = _target_block_bytes()
        tr = max(sublane, (block_bytes // (_LANE * itemsize)) // sublane * sublane)

        # Guarantee >=2 (ideally 4, even count) grid steps so both v7x
        # TensorCores are used and read/compute/write overlap is possible.
        if rows >= 4 * sublane:
            min_blocks = 4
        elif rows >= 2 * sublane:
            min_blocks = 2
        else:
            min_blocks = 1
        nblocks = max(pl.cdiv(rows, tr), min_blocks)
        if nblocks > 1 and nblocks % 2:
            nblocks += 1  # even block count shards evenly across 2 TensorCores
        tr = max(sublane, pl.cdiv(pl.cdiv(rows, nblocks), sublane) * sublane)

        # Scoped-VMEM budget: in + out, double-buffered, plus headroom.
        # Caps at 48 MiB (below physical VMEM on v5e/v6e/v7x).
        tile_bytes = tr * _LANE * itemsize
        vmem_limit = min(48 << 20, 4 * tile_bytes + (16 << 20))

        outs.append(_swish_2d(x2d, tr, vmem_limit).reshape(-1))

    if tail:
        # Ragged (<128-element) remainder: computed directly in JAX instead of
        # padding/copying the whole tensor through HBM an extra time.
        t = x_flat[n_main:].astype(jnp.float32)
        outs.append((t * jax.nn.sigmoid(t)).astype(dtype))

    out_flat = outs[0] if len(outs) == 1 else jnp.concatenate(outs)
    return out_flat.reshape(orig_shape)


if __name__ == "__main__":
    key = jax.random.PRNGKey(0)
    # Small NCHW input consistent with the module's expected usage.
    x = jax.random.normal(key, (2, 4, 16, 16), dtype=jnp.float32)

    out = swish(x)
    out = jax.block_until_ready(out)

    # Reference check in plain JAX.
    ref = x * jax.nn.sigmoid(x)
    assert out.shape == x.shape and out.dtype == x.dtype
    assert jnp.allclose(out, ref, atol=1e-5, rtol=1e-5)

    print("KERNEL_OK")
</pallas_src>

<mosaic_0001>
module attributes {stable_mosaic.version = 11 : i64} {
  func.func @_swish_kernel(%arg0: i32, %arg1: memref<8x128xf32, #tpu.memory_space<vmem>>, %arg2: memref<8x128xf32, #tpu.memory_space<vmem>>) attributes {dimension_semantics = [#tpu.dimension_semantics<parallel>], iteration_bounds = array<i64: 2>, scalar_prefetch = 0 : i64, scratch_operands = 0 : i64, tpu.core_type = #tpu.core_type<tc>, window_params = [{transform_indices = @transform_0, window_bounds = array<i64: 8, 128>}, {transform_indices = @transform_1, window_bounds = array<i64: 8, 128>}]} {
    %c0 = arith.constant 0 : index
    %c0_0 = arith.constant 0 : index
    %0 = vector.load %arg1[%c0, %c0_0] : memref<8x128xf32, #tpu.memory_space<vmem>>, vector<8x128xf32>
    %cst = arith.constant 5.000000e-01 : f32
    %1 = vector.broadcast %cst : f32 to vector<8x128xf32>
    %2 = arith.mulf %1, %0 : vector<8x128xf32>
    %3 = math.tanh %2 : vector<8x128xf32>
    %cst_1 = arith.constant 1.000000e+00 : f32
    %4 = vector.broadcast %cst_1 : f32 to vector<8x128xf32>
    %5 = arith.addf %3, %4 : vector<8x128xf32>
    %cst_2 = arith.constant 5.000000e-01 : f32
    %6 = vector.broadcast %cst_2 : f32 to vector<8x128xf32>
    %7 = arith.mulf %6, %5 : vector<8x128xf32>
    %8 = arith.mulf %0, %7 : vector<8x128xf32>
    %c0_3 = arith.constant 0 : index
    %c0_4 = arith.constant 0 : index
    %9 = vector.load %arg2[%c0_3, %c0_4] : memref<8x128xf32, #tpu.memory_space<vmem>>, vector<8x128xf32>
    tpu.vector_store %arg2[%c0_3, %c0_4], %8 {strides = array<i32>} : memref<8x128xf32, #tpu.memory_space<vmem>>, vector<8x128xf32>,
    return
  }
  func.func @transform_0(%arg0: i32) -> (i32, i32) {
    %c0_i32 = arith.constant 0 : i32
    %c0_i32_0 = arith.constant 0 : i32
    return %arg0, %c0_i32 : i32, i32
  }
  func.func @transform_1(%arg0: i32) -> (i32, i32) {
    %c0_i32 = arith.constant 0 : i32
    %c0_i32_0 = arith.constant 0 : i32
    return %arg0, %c0_i32 : i32, i32
  }
}

</mosaic_0001>

<bundles_post_ra>
// kernel: tpu_custom_call.1
= control target key start
LH: loop header
LB: loop body
LE: loop exit
PB: predicated region body
PF: predicated region fallthrough
CT: control target
= control target key end

     0   :  { %6 = vsyncpa [#allocation3], 0  ;;  %s554_s0 = inlined_call_operand.hbm [shape: f32[16,128], index: 0, kind: input, shape index: {}]   ;;  %s555_s1 = inlined_call_operand.hbm [shape: f32[16,128], index: 1, kind: output, shape index: {}]  }
   0x1   :  { %8 = vsyncpa [#allocation3 + $0x1], 0 }
   0x2   :  { %9 = vsyncpa [#allocation4], 0 }
   0x3   :  { %11 = vsyncpa [#allocation4 + $0x1], 0  ;;  %s393_s6 = smov 0   ;;  %s395_s7 = smov 0  }
   0x4   :  { %s397_s8 = smov 0   ;;  %s399_s9 = smov 0  }
   0x5 LB: > { %s414_s10 = sadd.s32 4294967295, %s379_s9   ;;  %s223_s11 = sadd.s32 4294967294, %s379_s9   ;;  %s379_s9 = sphi %s399_s9, %s570_s9   ;;  %s375_s8 = sphi %s397_s8, %s569_s8   ;;  %s371_s7 = sphi %s395_s7, %s568_s7   ;;  %s367_s6 = sphi %s393_s6, %s567_s6  }
   0x6   : > { %s418_s12 = sadd.s32 1, %s379_s9   ;;  %s24_s13 = sadd.s32 1, %s375_s8 }
   0x7   : > { %s21_s14 = ssub.s32 %s379_s9, %s418_s12  ;;  %p31_p0 = scmp.ne.s32.totalorder %s375_s8, %s371_s7 }
   0x8   : > { %p22_p1 = scmp.eq.s32.totalorder %s21_s14, 0  ;;  %p32_p2 = scmp.eq.s32.totalorder %s379_s9, 0 }
   0x9   : > { %p37_p3 = scmp.ne.s32.totalorder %s371_s7, %s367_s6  ;;  %p38_p4 = scmp.eq.s32.totalorder %s414_s10, 0 }
   0xa   : > { %s430_s15 = scalar_select %p22_p1, %s375_s8, %s24_s13  }
   0xb   : > { %p432_p5 = por %p32_p2, %p31_p0  ;;  %p436_p6 = por %p38_p4, %p37_p3 }
   0xc   : > { %p61_p7 = scmp.eq.s32.totalorder %s414_s10, 1  ;;  %p67_p8 = scmp.eq.s32.totalorder %s223_s11, 1 }
   0xd   : > { %p247_p10 = scmp.lt.s32.totalorder %s379_s9, 2  ;;  %s87_s20 = sand.u32 1, %s375_s8  }
   0xe   : > { %p443_p11 = por %p61_p7, %p31_p0  ;;  %p447_p12 = por %p67_p8, %p37_p3 }
   0xf   : > { %s227_s21 = sshll.u32 %s379_s9, 7  ;;  %s226_s22 = sshll.u32 %s87_s20, 3 }
  0x10   : > { %s559_s18 = scalar_select %p443_p11, 1, 0 }
  0x11   : > { %s560_s19 = scalar_select %p447_p12, 1, 0 }
  0x12   : > { %s456_s25 = scalar_lea.hbm %s554_s0, %s227_s21  ;;  %s91_s26 = scalar_lea.vmem [#allocation2], %s226_s22 }
  0x13   : > { %s98_s27 = sshll.u32 %s91_s26, 4  ;;  %p460_p13 = pnand %p247_p10, %p432_p5  ;;  %s464_s27 = int_to_ptr.vmem [resolvable:$true] %s98_s27 }
  0x14   : > { %s88_s29 = scalar_lea.sflag [#allocation3], %s87_s20  ;;  %s283_s30 = scalar_lea.hbm %s456_s25, 128 }
  0x15   : > { %p284_p2 = scmp.ne.s32.totalorder %s456_s25, %s283_s30  ;;  %p285_p3 = pneg %p460_p13 }
  0x16   : > { %s288_s4 = scalar_lea.hbm %s554_s0, 256  ;;  %p289_p5 = scmp.lt.u32.totalorder %s456_s25, %s554_s0 }
  0x17   : > { %p286_p4 = pnand %p285_p3, %p284_p2  ;;  %p290_p8 = scmp.lt.u32.totalorder %s288_s4, %s283_s30 }
  0x18   : > { %p292_p9 = scmp.lt.u32.totalorder %s283_s30, %s456_s25 }
  0x19   : > { %p287_p7 = pneg %p286_p4  ;;  %p291_p10 = por %p290_p8, %p289_p5 }
  0x1b   : > { %p293_p0 = por %p292_p9, %p291_p10 }
  0x1d   : > { %p294_p1 = pnand %p293_p0, %p287_p7 }
  0x1f   : > { %297 = shalt.err (!%p294_p1)
}
  0x20   : > { %s298_s13 = scalar_lea.vmem %s464_s27, 128  ;;  %s381_s14 = smov [#allocation2]  }
  0x21   : > { %p299_p2 = scmp.ne.s32.totalorder %s464_s27, %s298_s13  ;;  %s303_s16 = sshll.u32 %s381_s14, 4  ;;  %s304_s16 = int_to_ptr.vmem [resolvable:$false] %s303_s16 }
  0x22   : > { %s305_s20 = scalar_lea.vmem %s304_s16, 256  ;;  %p306_p11 = scmp.lt.s32.totalorder %s464_s27, %s304_s16 }
  0x23   : > { %p301_p4 = pnand %p299_p2, %p285_p3  ;;  %p307_p5 = scmp.lt.s32.totalorder %s305_s20, %s298_s13 }
  0x25   : > { %p302_p12 = pneg %p301_p4  ;;  %p308_p8 = por %p307_p5, %p306_p11 }
  0x27   : > { %p309_p9 = pnand %p308_p8, %p302_p12 }
  0x29   : > { %312 = shalt.err (!%p309_p9)
}
  0x2a   : > { %242 = dma.hbm_to_vmem [thread:$0]  (!%p460_p13), %s456_s25, 128, %s464_s27, %s88_s29  }
  0x2b   : > { %p562_p0 = scmp.lt.s32.totalorder %s379_s9, 3  ;;  %p563_p1 = scmp.ge.s32.totalorder %s379_s9, 1 }
  0x2d   : > { %p104_p3 = pnand %p563_p1, %p562_p0 }
  0x2e   : > { %s498_s21 = sand.u32 (!%p104_p3), 1, %s371_s7  }
  0x2f   : > { %107 = sbr.rel (%p104_p3) target bundleno = 89 (0x59), region = 24  ;;  %s229_s22 = sshll.u32 (!%p104_p3), %s498_s21, 3 }
  0x30   : > { %s110_s23 = scalar_lea.sflag (!%p104_p3), [#allocation3], %s498_s21  ;;  %s113_s24 = scalar_lea.vmem (!%p104_p3), [#allocation2], %s229_s22 }
  0x36   : > { %358 = dma.done.wait (%p436_p6), %s110_s23, 128  }
  0x37   : > { %360 = vsyncadd (%p436_p6), %s110_s23, 4294967168  ;;  %v132_v0 = vld [vmem:[%s113_s24] sm:$0xff]  ;;  %s131_s25 = scalar_lea.vmem [#allocation5], %s229_s22  ;;  %s232_s27 = sshll.u32 %s414_s10, 7 }
  0x38   : > { %v133_v1 = vmul.f32 0.5, %v132_v0  ;;  %s153_s26 = sshll.u32 %s131_s25, 4  ;;  %s512_s17 = scalar_lea.hbm %s555_s1, %s232_s27  ;;  %s507_s26 = int_to_ptr.vmem [resolvable:$true] %s153_s26 }
  0x39   : > { %s140_s30 = scalar_lea.sflag [#allocation4], %s498_s21  ;;  %s313_s2 = scalar_lea.vmem %s507_s26, 128 }
  0x3a   : > { %281 = vtanh.f32 %v133_v1  ;;  %p314_p6 = scmp.ne.s32.totalorder %s507_s26, %s313_s2  ;;  %p564_p11 = scmp.ne.s32.totalorder %s559_s18, 0 }
  0x3b   : > { %s382_s10 = smov [#allocation5]  }
  0x3c   : > { %p315_p12 = pnand %p314_p6, %p564_p11  ;;  %s317_s3 = sshll.u32 %s382_s10, 4  ;;  %s318_s3 = int_to_ptr.vmem [resolvable:$false] %s317_s3 }
  0x3d   : > { %s319_s4 = scalar_lea.vmem %s318_s3, 256  ;;  %p320_p7 = scmp.lt.s32.totalorder %s507_s26, %s318_s3 }
  0x3e   : > { %p316_p13 = pneg %p315_p12  ;;  %p321_p10 = scmp.lt.s32.totalorder %s319_s4, %s313_s2 }
  0x40   : > { %p322_p2 = por %p321_p10, %p320_p7 }
  0x42   : > { %p323_p4 = pnand %p322_p2, %p316_p13 }
  0x44   : > { %v282_v2 = vpop.eup %281 }
  0x45   : > { %v135_v3 = vadd.f32 1.0, %v282_v2 }
  0x47   : > { %v136_v4 = vmul.f32 0.5, %v135_v3 }
  0x49   : > { %v137_v5 = vmul.f32 %v136_v4, %v132_v0 }
  0x4b   : > { %138 = vst [vmem:[%s131_s25] sm:$0xff] %v137_v5 }
  0x4c   : > { %326 = shalt.err (!%p323_p4)
}
  0x4d   : > { %s327_s5 = scalar_lea.hbm %s512_s17, 128  ;;  %s331_s14 = scalar_lea.hbm %s555_s1, 256 }
  0x4e   : > { %p328_p5 = scmp.ne.s32.totalorder %s512_s17, %s327_s5  ;;  %p332_p0 = scmp.lt.u32.totalorder %s512_s17, %s555_s1 }
  0x4f   : > { %p333_p1 = scmp.lt.u32.totalorder %s331_s14, %s327_s5  ;;  %p335_p6 = scmp.lt.u32.totalorder %s327_s5, %s512_s17 }
  0x50   : > { %p329_p8 = pnand %p328_p5, %p564_p11 }
  0x51   : > { %p334_p3 = por %p333_p1, %p332_p0 }
  0x52   : > { %p330_p9 = pneg %p329_p8 }
  0x53   : > { %p336_p12 = por %p335_p6, %p334_p3 }
  0x55   : > { %p337_p13 = pnand %p336_p12, %p330_p9 }
  0x57   : > { %340 = shalt.err (!%p337_p13)
}
  0x58   : > { %237 = dma.vmem_to_hbm [thread:$0]  (%p564_p11), %s507_s26, 128, %s512_s17, %s140_s30  }
  0x59 PF: > { %s165_s21 = sand.u32 1, %s367_s6   ;;  %p565_p7 = scmp.ne.s32.totalorder %s560_s19, 0 }
  0x5a   : > { %p566_p10 = scmp.ge.s32.totalorder %s379_s9, 2  ;;  %s166_s22 = scalar_lea.sflag [#allocation4], %s165_s21 }
  0x5c   : > { %p244_p2 = pnand %p566_p10, %p565_p7 }
  0x5e   : > { %362 = dma.done.wait (!%p244_p2), %s166_s22, 128  }
  0x5f   : > { %364 = vsyncadd (!%p244_p2), %s166_s22, 4294967168  ;;  %p14_p4 = scmp.ge.s32.totalorder %s418_s12, 4   ;;  %s567_s6 = smov %s371_s7 }
  0x60   : > { %s568_s7 = smov %s375_s8  ;;  %s569_s8 = smov %s430_s15 }
  0x61   : > { %s570_s9 = smov %s418_s12  ;;  %16 = sbr.rel (!%p14_p4) target bundleno = 5 (0x5), region = 69 }
  0x68   :  { %171 = vsyncpa [#allocation3], 1 }
  0x69   :  { %173 = vsyncpa [#allocation3 + $0x1], 1 }
  0x6a   :  { %174 = vsyncpa [#allocation4], 1 }
  0x6b   :  { %176 = vsyncpa [#allocation4 + $0x1], 1 }

</bundles_post_ra>
